<compile_context>
chip_gen: v5e
topology: v5e:2x2
jax: 0.10.0
libtpu: 0.0.40
codegen_flags: <defaults>
</compile_context>

<pallas_src>
import functools

import jax
import jax.numpy as jnp
from jax.experimental import pallas as pl
from jax.experimental.pallas import tpu as pltpu

LANE = 128
SUBLANE = 8


def _round_up(n, m):
    return ((n + m - 1) // m) * m


# ----------------------------------------------------------------------------
# Kernel: one batch tile (TB rows) of the 3-layer MLP + masked softmax.
# All refs are lane-padded to multiples of 128; weights are bf16, biases f32.
# ----------------------------------------------------------------------------
def mlp_softmax_kernel(x_ref, w1_ref, b1_ref, w2_ref, b2_ref, w3_ref, b3_ref,
                       out_ref, *, n_valid_out):
    cdt = w1_ref.dtype  # matmul compute dtype (bf16)

    x = x_ref[...]
    h1 = jnp.tanh(
        jnp.dot(x, w1_ref[...], preferred_element_type=jnp.float32)
        + b1_ref[...])
    h2 = jnp.tanh(
        jnp.dot(h1.astype(cdt), w2_ref[...], preferred_element_type=jnp.float32)
        + b2_ref[...])
    logits = (
        jnp.dot(h2.astype(cdt), w3_ref[...], preferred_element_type=jnp.float32)
        + b3_ref[...])

    # Padded action columns must not contribute to the softmax denominator.
    col = jax.lax.broadcasted_iota(jnp.int32, logits.shape, 1)
    logits = jnp.where(col < n_valid_out, logits, -jnp.inf)

    # Numerically-stable softmax over the (padded) action dimension.
    m = jnp.max(logits, axis=-1, keepdims=True)
    e = jnp.exp(logits - m)
    denom = jnp.sum(e, axis=-1, keepdims=True)
    out_ref[...] = (e * pl.reciprocal(denom, approx=True)).astype(out_ref.dtype)


# ----------------------------------------------------------------------------
# Wrapper: pad to TPU-friendly shapes, tile the batch, slice back.
# ----------------------------------------------------------------------------
def net_forward(x, params, *, block_batch=128, compute_dtype=jnp.bfloat16):
    """Returns the Categorical `probs` (batch, n_outer) as float32."""
    w1, b1, w2, b2, w3, b3 = params
    B, F = x.shape
    H = w1.shape[1]
    O = w3.shape[1]

    Fp = _round_up(max(F, LANE), LANE)
    Hp = _round_up(max(H, LANE), LANE)
    Op = _round_up(max(O, LANE), LANE)
    TB = min(block_batch, _round_up(B, SUBLANE))
    Bp = _round_up(B, TB)

    # Zero-pad activations/weights; zeros contribute nothing to the matmuls
    # and padded logits are masked inside the kernel.
    x_p = jnp.zeros((Bp, Fp), compute_dtype).at[:B, :F].set(x.astype(compute_dtype))
    w1_p = jnp.zeros((Fp, Hp), compute_dtype).at[:F, :H].set(w1.astype(compute_dtype))
    w2_p = jnp.zeros((Hp, Hp), compute_dtype).at[:H, :H].set(w2.astype(compute_dtype))
    w3_p = jnp.zeros((Hp, Op), compute_dtype).at[:H, :O].set(w3.astype(compute_dtype))
    b1_p = jnp.zeros((1, Hp), jnp.float32).at[:, :H].set(b1)
    b2_p = jnp.zeros((1, Hp), jnp.float32).at[:, :H].set(b2)
    b3_p = jnp.zeros((1, Op), jnp.float32).at[:, :O].set(b3)

    grid = (Bp // TB,)
    pinned = lambda shape: pl.BlockSpec(shape, lambda i: (0, 0))  # VMEM-resident

    probs_p = pl.pallas_call(
        functools.partial(mlp_softmax_kernel, n_valid_out=O),
        out_shape=jax.ShapeDtypeStruct((Bp, Op), jnp.float32),
        grid=grid,
        in_specs=[
            pl.BlockSpec((TB, Fp), lambda i: (i, 0)),   # batch-tiled input
            pinned((Fp, Hp)), pinned((1, Hp)),
            pinned((Hp, Hp)), pinned((1, Hp)),
            pinned((Hp, Op)), pinned((1, Op)),
        ],
        out_specs=pl.BlockSpec((TB, Op), lambda i: (i, 0)),
        compiler_params=pltpu.CompilerParams(
            dimension_semantics=("parallel",)),
    )(x_p, w1_p, b1_p, w2_p, b2_p, w3_p, b3_p)

    return probs_p[:B, :O]


# ----------------------------------------------------------------------------
# Deterministic parameter init mirroring Net.__init__:
#   orthogonal_(weight, gain=std), constant_(bias, 0.0)
# Weights stored as (in_features, out_features) so the kernel computes x@W+b.
# ----------------------------------------------------------------------------
def orthogonal_init(key, out_features, in_features, std):
    rows, cols = out_features, in_features
    flat = jax.random.normal(key, (max(rows, cols), min(rows, cols)),
                             dtype=jnp.float32)
    q, r = jnp.linalg.qr(flat)
    q = q * jnp.sign(jnp.diagonal(r))[None, :]
    if rows < cols:
        q = q.T
    w = std * q[:rows, :cols]          # torch layout (out, in)
    return w.T                          # kernel layout (in, out)


def init_params(key, n_feature, n_hidden, n_outer):
    k1, k2, k3 = jax.random.split(key, 3)
    w1 = orthogonal_init(k1, n_hidden, n_feature, std=1.0)
    w2 = orthogonal_init(k2, n_hidden, n_hidden, std=0.1)
    w3 = orthogonal_init(k3, n_outer, n_hidden, std=0.1)
    b1 = jnp.zeros((1, n_hidden), jnp.float32)
    b2 = jnp.zeros((1, n_hidden), jnp.float32)
    b3 = jnp.zeros((1, n_outer), jnp.float32)
    return (w1, b1, w2, b2, w3, b3)


def reference_forward(x, params, compute_dtype=jnp.bfloat16):
    """Plain-JAX reference with the same bf16 matmul / f32 accumulate math."""
    w1, b1, w2, b2, w3, b3 = params
    cd = compute_dtype
    h1 = jnp.tanh(jnp.dot(x.astype(cd), w1.astype(cd),
                          preferred_element_type=jnp.float32) + b1)
    h2 = jnp.tanh(jnp.dot(h1.astype(cd), w2.astype(cd),
                          preferred_element_type=jnp.float32) + b2)
    logits = jnp.dot(h2.astype(cd), w3.astype(cd),
                     preferred_element_type=jnp.float32) + b3
    return jax.nn.softmax(logits, axis=-1)


if __name__ == "__main__":
    # RL-rollout-style batching: per review, amortize launch/DMA overhead by
    # pushing many forward passes through one pallas_call.
    n_feature, n_hidden, n_outer = 16, 32, 8
    batch = 256

    key = jax.random.PRNGKey(0)
    k_x, k_p = jax.random.split(key)
    x = jax.random.normal(k_x, (batch, n_feature), dtype=jnp.float32)
    params = init_params(k_p, n_feature, n_hidden, n_outer)

    probs = net_forward(x, params)
    jax.block_until_ready(probs)

    ref = reference_forward(x, params)
    assert probs.shape == (batch, n_outer), "wrong output shape"
    assert jnp.allclose(probs, ref, atol=2e-3, rtol=2e-3), "mismatch vs ref"
    assert jnp.allclose(jnp.sum(probs, axis=-1), 1.0, atol=2e-3), "probs !sum to 1"

    # TODO(synk): torch.distributions.Categorical is a sampling wrapper, not a
    # tensor op; the kernel returns its `probs` parameterization.
    print("KERNEL_OK")
</pallas_src>

<mosaic_0001>
module attributes {stable_mosaic.version = 11 : i64} {
  func.func @mlp_softmax_kernel(%arg0: i32, %arg1: memref<128x128xbf16, #tpu.memory_space<vmem>>, %arg2: memref<128x128xbf16, #tpu.memory_space<vmem>>, %arg3: memref<1x128xf32, #tpu.memory_space<vmem>>, %arg4: memref<128x128xbf16, #tpu.memory_space<vmem>>, %arg5: memref<1x128xf32, #tpu.memory_space<vmem>>, %arg6: memref<128x128xbf16, #tpu.memory_space<vmem>>, %arg7: memref<1x128xf32, #tpu.memory_space<vmem>>, %arg8: memref<128x128xf32, #tpu.memory_space<vmem>>) attributes {dimension_semantics = [#tpu.dimension_semantics<parallel>], iteration_bounds = array<i64: 2>, scalar_prefetch = 0 : i64, scratch_operands = 0 : i64, tpu.core_type = #tpu.core_type<tc>, window_params = [{transform_indices = @transform_0, window_bounds = array<i64: 128, 128>}, {pipeline_mode = #tpu.pipeline_mode<synchronous>, transform_indices = @transform_1, window_bounds = array<i64: 128, 128>}, {pipeline_mode = #tpu.pipeline_mode<synchronous>, transform_indices = @transform_2, window_bounds = array<i64: 1, 128>}, {pipeline_mode = #tpu.pipeline_mode<synchronous>, transform_indices = @transform_3, window_bounds = array<i64: 128, 128>}, {pipeline_mode = #tpu.pipeline_mode<synchronous>, transform_indices = @transform_4, window_bounds = array<i64: 1, 128>}, {pipeline_mode = #tpu.pipeline_mode<synchronous>, transform_indices = @transform_5, window_bounds = array<i64: 128, 128>}, {pipeline_mode = #tpu.pipeline_mode<synchronous>, transform_indices = @transform_6, window_bounds = array<i64: 1, 128>}, {transform_indices = @transform_7, window_bounds = array<i64: 128, 128>}]} {
    %c0 = arith.constant 0 : index
    %c0_0 = arith.constant 0 : index
    %0 = vector.load %arg1[%c0, %c0_0] : memref<128x128xbf16, #tpu.memory_space<vmem>>, vector<128x128xbf16>
    %c0_1 = arith.constant 0 : index
    %c0_2 = arith.constant 0 : index
    %1 = vector.load %arg2[%c0_1, %c0_2] : memref<128x128xbf16, #tpu.memory_space<vmem>>, vector<128x128xbf16>
    %cst = arith.constant dense<0.000000e+00> : vector<128x128xf32>
    %2 = tpu.matmul %0, %1, %cst {dimension_numbers = #tpu.dot_dimension_numbers<[1], [0], [0], [1], [0, 0, 1, 1], [], []>} : vector<128x128xbf16>, vector<128x128xbf16>, vector<128x128xf32> -> vector<128x128xf32>
    %c0_3 = arith.constant 0 : index
    %c0_4 = arith.constant 0 : index
    %3 = vector.load %arg3[%c0_3, %c0_4] : memref<1x128xf32, #tpu.memory_space<vmem>>, vector<1x128xf32>
    %4 = vector.broadcast %3 : vector<1x128xf32> to vector<128x128xf32>
    %5 = arith.addf %2, %4 : vector<128x128xf32>
    %6 = math.tanh %5 : vector<128x128xf32>
    %7 = arith.truncf %6 : vector<128x128xf32> to vector<128x128xbf16>
    %c0_5 = arith.constant 0 : index
    %c0_6 = arith.constant 0 : index
    %8 = vector.load %arg4[%c0_5, %c0_6] : memref<128x128xbf16, #tpu.memory_space<vmem>>, vector<128x128xbf16>
    %cst_7 = arith.constant dense<0.000000e+00> : vector<128x128xf32>
    %9 = tpu.matmul %7, %8, %cst_7 {dimension_numbers = #tpu.dot_dimension_numbers<[1], [0], [0], [1], [0, 0, 1, 1], [], []>} : vector<128x128xbf16>, vector<128x128xbf16>, vector<128x128xf32> -> vector<128x128xf32>
    %c0_8 = arith.constant 0 : index
    %c0_9 = arith.constant 0 : index
    %10 = vector.load %arg5[%c0_8, %c0_9] : memref<1x128xf32, #tpu.memory_space<vmem>>, vector<1x128xf32>
    %11 = vector.broadcast %10 : vector<1x128xf32> to vector<128x128xf32>
    %12 = arith.addf %9, %11 : vector<128x128xf32>
    %13 = math.tanh %12 : vector<128x128xf32>
    %14 = arith.truncf %13 : vector<128x128xf32> to vector<128x128xbf16>
    %c0_10 = arith.constant 0 : index
    %c0_11 = arith.constant 0 : index
    %15 = vector.load %arg6[%c0_10, %c0_11] : memref<128x128xbf16, #tpu.memory_space<vmem>>, vector<128x128xbf16>
    %cst_12 = arith.constant dense<0.000000e+00> : vector<128x128xf32>
    %16 = tpu.matmul %14, %15, %cst_12 {dimension_numbers = #tpu.dot_dimension_numbers<[1], [0], [0], [1], [0, 0, 1, 1], [], []>} : vector<128x128xbf16>, vector<128x128xbf16>, vector<128x128xf32> -> vector<128x128xf32>
    %c0_13 = arith.constant 0 : index
    %c0_14 = arith.constant 0 : index
    %17 = vector.load %arg7[%c0_13, %c0_14] : memref<1x128xf32, #tpu.memory_space<vmem>>, vector<1x128xf32>
    %18 = vector.broadcast %17 : vector<1x128xf32> to vector<128x128xf32>
    %19 = arith.addf %16, %18 : vector<128x128xf32>
    %20 = tpu.iota {dimensions = array<i32: 1>} : vector<128x128xi32>
    %c8_i32 = arith.constant 8 : i32
    %21 = vector.broadcast %c8_i32 : i32 to vector<128x128xi32>
    %22 = arith.cmpi slt, %20, %21 : vector<128x128xi32>
    %cst_15 = arith.constant 0xFF800000 : f32
    %23 = vector.broadcast %cst_15 : f32 to vector<128x128xf32>
    %24 = arith.select %22, %19, %23 : vector<128x128xi1>, vector<128x128xf32>
    %cst_16 = arith.constant dense<0xFF800000> : vector<128xf32>
    %25 = vector.multi_reduction <maximumf>, %24, %cst_16 [1] : vector<128x128xf32> to vector<128xf32>
    %26 = vector.shape_cast %25 : vector<128xf32> to vector<128x1xf32>
    %27 = vector.broadcast %26 : vector<128x1xf32> to vector<128x128xf32>
    %28 = arith.subf %24, %27 : vector<128x128xf32>
    %29 = math.exp %28 : vector<128x128xf32>
    %cst_17 = arith.constant dense<0.000000e+00> : vector<128xf32>
    %30 = vector.multi_reduction <add>, %29, %cst_17 [1] : vector<128x128xf32> to vector<128xf32>
    %31 = vector.shape_cast %30 : vector<128xf32> to vector<128x1xf32>
    %32 = tpu.reciprocal %31 {approx = true} : vector<128x1xf32> -> vector<128x1xf32>
    %33 = vector.broadcast %32 : vector<128x1xf32> to vector<128x128xf32>
    %34 = arith.mulf %29, %33 : vector<128x128xf32>
    %c0_18 = arith.constant 0 : index
    %c0_19 = arith.constant 0 : index
    %35 = vector.load %arg8[%c0_18, %c0_19] : memref<128x128xf32, #tpu.memory_space<vmem>>, vector<128x128xf32>
    tpu.vector_store %arg8[%c0_18, %c0_19], %34 {strides = array<i32>} : memref<128x128xf32, #tpu.memory_space<vmem>>, vector<128x128xf32>,
    return
  }
  func.func @transform_0(%arg0: i32) -> (i32, i32) {
    %c0_i32 = arith.constant 0 : i32
    %c0_i32_0 = arith.constant 0 : i32
    return %arg0, %c0_i32 : i32, i32
  }
  func.func @transform_1(%arg0: i32) -> (i32, i32) {
    %c0_i32 = arith.constant 0 : i32
    %c0_i32_0 = arith.constant 0 : i32
    %c0_i32_1 = arith.constant 0 : i32
    return %c0_i32, %c0_i32_0 : i32, i32
  }
  func.func @transform_2(%arg0: i32) -> (i32, i32) {
    %c0_i32 = arith.constant 0 : i32
    %c0_i32_0 = arith.constant 0 : i32
    %c0_i32_1 = arith.constant 0 : i32
    return %c0_i32, %c0_i32_0 : i32, i32
  }
  func.func @transform_3(%arg0: i32) -> (i32, i32) {
    %c0_i32 = arith.constant 0 : i32
    %c0_i32_0 = arith.constant 0 : i32
    %c0_i32_1 = arith.constant 0 : i32
    return %c0_i32, %c0_i32_0 : i32, i32
  }
  func.func @transform_4(%arg0: i32) -> (i32, i32) {
    %c0_i32 = arith.constant 0 : i32
    %c0_i32_0 = arith.constant 0 : i32
    %c0_i32_1 = arith.constant 0 : i32
    return %c0_i32, %c0_i32_0 : i32, i32
  }
  func.func @transform_5(%arg0: i32) -> (i32, i32) {
    %c0_i32 = arith.constant 0 : i32
    %c0_i32_0 = arith.constant 0 : i32
    %c0_i32_1 = arith.constant 0 : i32
    return %c0_i32, %c0_i32_0 : i32, i32
  }
  func.func @transform_6(%arg0: i32) -> (i32, i32) {
    %c0_i32 = arith.constant 0 : i32
    %c0_i32_0 = arith.constant 0 : i32
    %c0_i32_1 = arith.constant 0 : i32
    return %c0_i32, %c0_i32_0 : i32, i32
  }
  func.func @transform_7(%arg0: i32) -> (i32, i32) {
    %c0_i32 = arith.constant 0 : i32
    %c0_i32_0 = arith.constant 0 : i32
    return %arg0, %c0_i32 : i32, i32
  }
}

</mosaic_0001>

<bundles_post_ra>
// kernel: tpu_custom_call.1
= control target key start
LH: loop header
LB: loop body
LE: loop exit
PB: predicated region body
PF: predicated region fallthrough
CT: control target
= control target key end

     0   :  { %s2198_s0 = inlined_call_operand.hbm [shape: bf16[256,128], index: 0, kind: input, shape index: {}]   ;;  %s2199_s1 = inlined_call_operand.hbm [shape: bf16[128,128], index: 1, kind: input, shape index: {}]   ;;  %s2200_s2 = inlined_call_operand.vmem [shape: f32[1,128], index: 2, kind: input, shape index: {}]   ;;  %s2201_s3 = inlined_call_operand.hbm [shape: bf16[128,128], index: 3, kind: input, shape index: {}]   ;;  %s2202_s4 = inlined_call_operand.vmem [shape: f32[1,128], index: 4, kind: input, shape index: {}]   ;;  %s2203_s5 = inlined_call_operand.hbm [shape: bf16[128,128], index: 5, kind: input, shape index: {}]   ;;  %s2204_s6 = inlined_call_operand.vmem [shape: f32[1,128], index: 6, kind: input, shape index: {}]   ;;  %s2205_s7 = inlined_call_operand.hbm [shape: f32[256,128], index: 7, kind: output, shape index: {}]  }
   0x1   :  { %2208 = sst [smem:[#allocation15_spill]] %s2199_s1 }
   0x2   :  { %12 = vsyncpa [#allocation3], 0 }
   0x3   :  { %14 = vsyncpa [#allocation3 + $0x1], 0 }
   0x4   :  { %15 = vsyncpa [#allocation6], 0 }
   0x5   :  { %16 = vsyncpa [#allocation9], 0 }
   0x6   :  { %17 = vsyncpa [#allocation4], 0 }
   0x7   :  { %19 = vsyncpa [#allocation4 + $0x1], 0  ;;  %s1772_s24 = smov 0   ;;  %s1774_s25 = smov 0  }
   0x8   :  { %s1776_s26 = smov 0   ;;  %s1778_s27 = smov 0  }
   0x9 LB: > { %s1793_s28 = sadd.s32 4294967295, %s1723_s27   ;;  %s1111_s29 = sadd.s32 4294967294, %s1723_s27   ;;  %s1723_s27 = sphi %s1778_s27, %s2222_s27   ;;  %s1719_s26 = sphi %s1776_s26, %s2221_s26   ;;  %s1715_s25 = sphi %s1774_s25, %s2220_s25   ;;  %s1711_s24 = sphi %s1772_s24, %s2219_s24  }
   0xa   : > { %p45_p0 = scmp.ne.s32.totalorder %s1715_s25, %s1711_s24  ;;  %p46_p1 = scmp.eq.s32.totalorder %s1793_s28, 0 }
   0xb   : > { %p195_p2 = scmp.eq.s32.totalorder %s1793_s28, 1  ;;  %p201_p3 = scmp.eq.s32.totalorder %s1111_s29, 1 }
   0xc   : > { %p1802_p4 = por %p46_p1, %p45_p0  ;;  %p1112_p5 = scmp.ge.s32.totalorder %s1723_s27, 1 }
   0xd   : > { %p1807_p6 = por %p201_p3, %p45_p0  ;;  %p208_p7 = scmp.lt.s32.totalorder %s1723_s27, 3 }
   0xe   : > { %s2211_s1 = sld [smem:[#allocation15_spill]]  ;;  %s1725_s13 = smov [#allocation5]  }
   0xf   : > { %p1815_p8 = pnand %p1112_p5, %p208_p7  ;;  %s221_s14 = sshll.u32 %s1725_s13, 4  ;;  %s222_s14 = int_to_ptr.vmem [resolvable:$true] %s221_s14 }
  0x10   : > { %s236_s18 = sshll.u32 %s2201_s3, 4  ;;  %s2206_s19 = smov 64   ;;  %s237_s18 = int_to_ptr.hbm [resolvable:$true] %s236_s18 }
  0x11   : > { %p1333_p9 = pneg %p1815_p8  ;;  %s2207_s20 = smov 4  }
  0x12   : > { %s1728_s21 = smov [#allocation7]   ;;  %s253_s9 = sshll.u32 %s2203_s5, 4  ;;  %s254_s9 = int_to_ptr.hbm [resolvable:$true] %s253_s9 }
  0x13   : > { %p1823_p10 = pnand %p1333_p9, %p46_p1  ;;  %s238_s22 = sshll.u32 %s1728_s21, 4  ;;  %s239_s22 = int_to_ptr.vmem [resolvable:$true] %s238_s22 }
  0x14   : > { %s219_s11 = sshll.u32 %s2211_s1, 4  ;;  %s1729_s10 = smov [#allocation8]   ;;  %s220_s11 = int_to_ptr.hbm [resolvable:$true] %s219_s11 }
  0x15   : > { %1336 = dma.hbm_to_vmem [thread:$0]  (!%p1823_p10), %s220_s11, 1024, %s222_s14, [#allocation6], %s2206_s19, %s2206_s19, %s2207_s20  }
  0x16   : > { %1339 = dma.hbm_to_vmem [thread:$0]  (!%p1823_p10), %s237_s18, 1024, %s239_s22, [#allocation6], %s2206_s19, %s2206_s19, %s2207_s20  }
  0x17   : > { %s255_s11 = sshll.u32 %s1729_s10, 4  ;;  %s1845_s13 = sadd.s32 1, %s1723_s27   ;;  %s256_s11 = int_to_ptr.vmem [resolvable:$true] %s255_s11 }
  0x18   : > { %1342 = dma.hbm_to_vmem [thread:$0]  (!%p1823_p10), %s254_s9, 1024, %s256_s11, [#allocation9], %s2206_s19, %s2206_s19, %s2207_s20  }
  0x19   : > { %s29_s14 = ssub.s32 %s1723_s27, %s1845_s13  ;;  %s32_s16 = sadd.s32 1, %s1719_s26 }
  0x1a   : > { %p30_p12 = scmp.eq.s32.totalorder %s29_s14, 0  ;;  %p39_p13 = scmp.ne.s32.totalorder %s1719_s26, %s1715_s25 }
  0x1b   : > { %p40_p0 = scmp.eq.s32.totalorder %s1723_s27, 0  ;;  %p1354_p5 = scmp.lt.s32.totalorder %s1723_s27, 2 }
  0x1c   : > { %s1859_s17 = scalar_select %p30_p12, %s1719_s26, %s32_s16  }
  0x1d   : > { %p1863_p3 = por %p195_p2, %p39_p13  ;;  %s272_s21 = sand.u32 1, %s1719_s26  }
  0x1e   : > { %s1259_s15 = sshll.u32 %s1723_s27, 6  ;;  %p41_p7 = por %p40_p0, %p39_p13 }
  0x1f   : > { %s1117_s22 = sshll.u32 %s272_s21, 6  ;;  %s281_s9 = scalar_lea.hbm %s2198_s0, %s1259_s15 }
  0x20   : > { %s282_s10 = sshll.u32 %s281_s9, 4  ;;  %s276_s11 = scalar_lea.vmem [#allocation2], %s1117_s22  ;;  %s283_s10 = int_to_ptr.hbm [resolvable:$true] %s282_s10 }
  0x21   : > { %s284_s14 = sshll.u32 %s276_s11, 4  ;;  %p1873_p9 = pnand %p1354_p5, %p41_p7  ;;  %s285_s14 = int_to_ptr.vmem [resolvable:$true] %s284_s14 }
  0x22   : > { %s273_s19 = scalar_lea.sflag [#allocation3], %s272_s21  ;;  %s1619_s20 = sshra.s32 %s283_s10, 4  ;;  %s1620_s20 = int_to_ptr.hbm [resolvable:$true] %s1619_s20 }
  0x23   : > { %s1621_s1 = scalar_lea.hbm %s1620_s20, 64  ;;  %p1623_p10 = pneg %p1873_p9 }
  0x24   : > { %p1622_p2 = scmp.ne.s32.totalorder %s1620_s20, %s1621_s1  ;;  %s1626_s22 = scalar_lea.hbm %s2198_s0, 128 }
  0x25   : > { %p1627_p0 = scmp.lt.s32.totalorder %s1620_s20, %s2198_s0  ;;  %p1628_p5 = scmp.lt.s32.totalorder %s1626_s22, %s1621_s1 }
  0x26   : > { %p1624_p12 = pnand %p1623_p10, %p1622_p2 }
  0x27   : > { %p1629_p7 = por %p1628_p5, %p1627_p0 }
  0x28   : > { %p1625_p13 = pneg %p1624_p12 }
  0x2a   : > { %p1630_p11 = pnand %p1629_p7, %p1625_p13 }
  0x2c   : > { %1633 = shalt.err (!%p1630_p11)
}
  0x2d   : > { %s2216_s21 = smov 4   ;;  %s2217_s11 = smov 64  }
  0x2e   : > { %1346 = dma.hbm_to_vmem [thread:$0]  (!%p1873_p9), %s283_s10, 1024, %s285_s14, %s273_s19, %s2217_s11, %s2217_s11, %s2216_s21  }
  0x2f   : > { %296 = sbr.rel (%p1815_p8) target bundleno = 866 (0x362), region = 48  ;;  %s1893_s15 = sand.u32 (!%p1815_p8), 1, %s1715_s25  }
  0x30   : > { %s1121_s20 = sshll.u32 (!%p1815_p8), %s1893_s15, 6  ;;  %s299_s1 = scalar_lea.sflag (!%p1815_p8), [#allocation3], %s1893_s15 }
  0x31   : > { %s1897_s23 = scalar_lea.vmem (!%p1815_p8), [#allocation2], %s1121_s20 }
  0x34   : > { %1694 = dma.done.wait (%p1802_p4), %s299_s1, 1024  }
  0x35   : > { %1696 = vsyncadd (%p1802_p4), %s299_s1, 4294966272 }
  0x36   : > { %1698 = dma.done.wait (%p46_p1), [#allocation6], 2048  }
  0x37   : > { %1700 = vsyncadd (%p46_p1), [#allocation6], 4294965248 }
  0x38   : > { %1702 = dma.done.wait (%p46_p1), [#allocation9], 1024  }
  0x39   : > { %1704 = vsyncadd (%p46_p1), [#allocation9], 4294966272  ;;  %v1275_v0 = vld [vmem:[#allocation5 + $0x38] sm:$0xff]  ;;  %v1274_v1 = vld [vmem:[#allocation5 + $0x30] sm:$0xff]  ;;  %s1125_s22 = sshll.u32 %s1893_s15, 7  ;;  %s1292_s9 = sshll.u32 %s1793_s28, 7 }
  0x3a   : > { %483 = vmatpush.bf16.msra.mxu0 %v1275_v0  ;;  %1293 = vmatpush.bf16.msra.mxu3 %v1275_v0  ;;  %v1273_v2 = vld [vmem:[#allocation5 + $0x28] sm:$0xff]  ;;  %v1272_v3 = vld [vmem:[#allocation5 + $0x20] sm:$0xff]  ;;  %v1271_v4 = vld [vmem:[#allocation5 + $0x18] sm:$0xff]  ;;  %s2131_s29 = scalar_lea.vmem [#allocation10], %s1125_s22  ;;  %s1005_s20 = scalar_lea.hbm %s2205_s7, %s1292_s9 }
  0x3b   : > { %v1270_v5 = vld [vmem:[#allocation5 + $0x10] sm:$0xff]  ;;  %v1269_v6 = vld [vmem:[#allocation5 + $0x8] sm:$0xff]  ;;  %v1268_v7 = vld [vmem:[#allocation5] sm:$0xff]  ;;  %s1006_s1 = sshll.u32 %s2131_s29, 4  ;;  %s994_s28 = scalar_lea.sflag [#allocation4], %s1893_s15  ;;  %s1007_s1 = int_to_ptr.vmem [resolvable:$true] %s1006_s1 }
  0x3c   : > { %v1260_v8 = vld [vmem:[%s1897_s23] sm:$0xff]  ;;  %v1266_v9 = vld [vmem:[%s1897_s23 + $0x30] sm:$0xff]  ;;  %v1261_v10 = vld [vmem:[%s1897_s23 + $0x8] sm:$0xff]  ;;  %s1669_s14 = scalar_lea.hbm %s2205_s7, 256 }
  0x3d   : > { %v1267_v11 = vld [vmem:[%s1897_s23 + $0x38] sm:$0xff]  ;;  %v1262_v12 = vld [vmem:[%s1897_s23 + $0x10] sm:$0xff]  ;;  %v1281_v16 = vld [vmem:[#allocation7 + $0x28] sm:$0xff] }
  0x3e   : > { %484 = vmatpush.bf16.msra.mxu0 %v1274_v1  ;;  %1294 = vmatpush.bf16.msra.mxu3 %v1274_v1  ;;  %v1263_v13 = vld [vmem:[%s1897_s23 + $0x18] sm:$0xff]  ;;  %v1282_v15 = vld [vmem:[#allocation7 + $0x30] sm:$0xff]  ;;  %v1264_v17 = vld [vmem:[%s1897_s23 + $0x20] sm:$0xff] }
  0x3f   : > { %v1283_v14 = vld [vmem:[#allocation7 + $0x38] sm:$0xff]  ;;  %v1265_v18 = vld [vmem:[%s1897_s23 + $0x28] sm:$0xff]  ;;  %v1280_v19 = vld [vmem:[#allocation7 + $0x20] sm:$0xff]  ;;  %s1008_s23 = sshll.u32 %s1005_s20, 4  ;;  %s1009_s23 = int_to_ptr.hbm [resolvable:$true] %s1008_s23 }
  0x40   : > { %624 = vmatpush.bf16.msra.mxu1 %v1283_v14  ;;  %v1279_v20 = vld [vmem:[#allocation7 + $0x18] sm:$0xff]  ;;  %v1278_v21 = vld [vmem:[#allocation7 + $0x10] sm:$0xff]  ;;  %v1277_v22 = vld [vmem:[#allocation7 + $0x8] sm:$0xff]  ;;  %s1663_s30 = sshra.s32 %s1009_s23, 4  ;;  %s1664_s30 = int_to_ptr.hbm [resolvable:$true] %s1663_s30 }
  0x41   : > { %v1276_v23 = vld [vmem:[#allocation7] sm:$0xff]  ;;  %s1665_s12 = scalar_lea.hbm %s1664_s30, 128  ;;  %p1670_p11 = scmp.lt.s32.totalorder %s1664_s30, %s2205_s7 }
  0x42   : > { %485 = vmatpush.bf16.msra.mxu0 %v1273_v2  ;;  %1295 = vmatpush.bf16.msra.mxu3 %v1273_v2  ;;  %v1922_v25 = vld [vmem:[%s2200_s2] ss:$0 sm:$0xff]  ;;  %p1666_p1 = scmp.ne.s32.totalorder %s1664_s30, %s1665_s12  ;;  %p1671_p9 = scmp.lt.s32.totalorder %s1669_s14, %s1665_s12 }
  0x44   : > { %625 = vmatpush.bf16.msra.mxu1 %v1282_v15  ;;  %p1667_p4 = pnand %p1666_p1, %p1863_p3  ;;  %p1672_p2 = por %p1671_p9, %p1670_p11 }
  0x46   : > { %486 = vmatpush.bf16.msra.mxu0 %v1272_v3  ;;  %1296 = vmatpush.bf16.msra.mxu3 %v1272_v3  ;;  %p1668_p8 = pneg %p1667_p4 }
  0x48   : > { %626 = vmatpush.bf16.msra.mxu1 %v1281_v16  ;;  %p1673_p10 = pnand %p1672_p2, %p1668_p8 }
  0x4a   : > { %487 = vmatpush.bf16.msra.mxu0 %v1271_v4  ;;  %1297 = vmatpush.bf16.msra.mxu3 %v1271_v4  ;;  %v1291_v4 = vld [vmem:[#allocation8 + $0x38] sm:$0xff] }
  0x4b   : > { %765 = vmatpush.bf16.msra.mxu2 %v1291_v4 }
  0x4c   : > { %627 = vmatpush.bf16.msra.mxu1 %v1280_v19 }
  0x4e   : > { %488 = vmatpush.bf16.msra.mxu0 %v1270_v5  ;;  %1298 = vmatpush.bf16.msra.mxu3 %v1270_v5 }
  0x50   : > { %628 = vmatpush.bf16.msra.mxu1 %v1279_v20 }
  0x52   : > { %489 = vmatpush.bf16.msra.mxu0 %v1269_v6  ;;  %1299 = vmatpush.bf16.msra.mxu3 %v1269_v6  ;;  %v1290_v6 = vld [vmem:[#allocation8 + $0x30] sm:$0xff] }
  0x53   : > { %766 = vmatpush.bf16.msra.mxu2 %v1290_v6 }
  0x54   : > { %629 = vmatpush.bf16.msra.mxu1 %v1278_v21 }
  0x56   : > { %490 = vmatpush.bf16.msra.mxu0 %v1268_v7  ;;  %1300 = vmatpush.bf16.msra.mxu3 %v1268_v7 }
  0x58   : > { %630 = vmatpush.bf16.msra.mxu1 %v1277_v22 }
  0x59   : > { %491 = vmatmul.bf16.vlgmr.msra.gmra.mxu0 %v1260_v8  ;;  %521 = vmatmul.bf16.vlgmr.msra.gmra.mxu3 %v1266_v9  ;;  %v1289_v9 = vld [vmem:[#allocation8 + $0x28] sm:$0xff] }
  0x5a   : > { %1301 = vmatpush.bf16.msrb.mxu3 %v1283_v14  ;;  %767 = vmatpush.bf16.msra.mxu2 %v1289_v9 }
  0x5c   : > { %631 = vmatpush.bf16.msra.mxu1 %v1276_v23 }
  0x5e   : > { %1302 = vmatpush.bf16.msrb.mxu3 %v1282_v15 }
  0x62   : > { %1303 = vmatpush.bf16.msrb.mxu3 %v1281_v16 }
  0x66   : > { %1304 = vmatpush.bf16.msrb.mxu3 %v1280_v19 }
  0x69   : > { %496 = vmatmul.bf16.gmra.mxu0 %v1261_v10  ;;  %526 = vmatmul.bf16.gmra.mxu3 %v1267_v11 }
  0x6a   : > { %1305 = vmatpush.bf16.msrb.mxu3 %v1279_v20  ;;  %v1288_v20 = vld [vmem:[#allocation8 + $0x20] sm:$0xff] }
  0x6b   : > { %768 = vmatpush.bf16.msra.mxu2 %v1288_v20 }
  0x6e   : > { %1306 = vmatpush.bf16.msrb.mxu3 %v1278_v21  ;;  %v1287_v21 = vld [vmem:[#allocation8 + $0x18] sm:$0xff] }
  0x6f   : > { %769 = vmatpush.bf16.msra.mxu2 %v1287_v21 }
  0x72   : > { %1307 = vmatpush.bf16.msrb.mxu3 %v1277_v22  ;;  %v1286_v22 = vld [vmem:[#allocation8 + $0x10] sm:$0xff] }
  0x73   : > { %770 = vmatpush.bf16.msra.mxu2 %v1286_v22 }
  0x76   : > { %1308 = vmatpush.bf16.msrb.mxu3 %v1276_v23  ;;  %v1285_v23 = vld [vmem:[#allocation8 + $0x8] sm:$0xff] }
  0x77   : > { %771 = vmatpush.bf16.msra.mxu2 %v1285_v23 }
  0x79   : > { %501 = vmatmul.bf16.gmra.mxu0 %v1262_v12 }
  0x7a   : > { %1309 = vmatpush.bf16.msra.mxu3 %v1291_v4 }
  0x7e   : > { %1310 = vmatpush.bf16.msra.mxu3 %v1290_v6 }
  0x82   : > { %1311 = vmatpush.bf16.msra.mxu3 %v1289_v9 }
  0x86   : > { %1312 = vmatpush.bf16.msra.mxu3 %v1288_v20  ;;  %v1966_v20 = vld [vmem:[%s2204_s6] ss:$0 sm:$0xff] }
  0x89   : > { %506 = vmatmul.bf16.gmra.mxu0 %v1263_v13 }
  0x8a   : > { %1313 = vmatpush.bf16.msra.mxu3 %v1287_v21 }
  0x8e   : > { %1314 = vmatpush.bf16.msra.mxu3 %v1286_v22 }
  0x92   : > { %1315 = vmatpush.bf16.msra.mxu3 %v1285_v23 }
  0x99   : > { %511 = vmatmul.bf16.gmra.mxu0 %v1264_v17 }
  0xa9   : > { %516 = vmatmul.bf16.gmra.mxu0 %v1265_v18 }
  0xd6   : > { %v492_v24 = vpop.f32.mrf.mxu0 }
  0xd7   : > { %v493_v26 = vadd.f32 %v1922_v25, %v492_v24  ;;  %v1284_v24 = vld [vmem:[#allocation8] sm:$0xff] }
  0xd8   : > { %772 = vmatpush.bf16.msra.mxu2 %v1284_v24  ;;  %1316 = vmatpush.bf16.msra.mxu3 %v1284_v24 }
  0xd9   : > { %1401 = vtanh.f32 %v493_v26  ;;  %v1943_v26 = vld [vmem:[%s2202_s4] ss:$0 sm:$0xff] }
  0xdc   : > { %v522_v27 = vpop.f32.mrf.mxu3 }
  0xdd   : > { %v523_v30 = vadd.f32 %v1922_v25, %v522_v27 }
  0xde   : > { %v494_v28 = vpop.f32.mrf.mxu0 }
  0xdf   : > { %v495_v29 = vadd.f32 %v1922_v25, %v494_v28  ;;  %v1402_v33 = vpop.eup %1401 }
  0xe1   : > { %1403 = vtanh.f32 %v495_v29 }
  0xe2   : > { %1405 = vtanh.f32 %v523_v30 }
  0xe4   : > { %v524_v31 = vpop.f32.mrf.mxu3 }
  0xe5   : > { %v525_v32 = vadd.f32 %v1922_v25, %v524_v31 }
  0xe6   : > { %v497_v34 = vpop.f32.mrf.mxu0 }
  0xe7   : > { %v1404_v35 = vpop.eup %1403  ;;  %1407 = vtanh.f32 %v525_v32  ;;  %v498_v38 = vadd.f32 %v1922_v25, %v497_v34 }
  0xe8   : > { %v548_v36 = vpack.c.bf16 %v1404_v35, %v1402_v33  ;;  %v1406_v37 = vpop.eup %1405 }
  0xe9   : > { %1409 = vtanh.f32 %v498_v38 }
  0xea   : > { %632 = vmatmul.bf16.vlgmr.msra.gmra.mxu1 %v548_v36 }
  0xec   : > { %v527_v43 = vpop.f32.mrf.mxu3 }
  0xed   : > { %v1408_v39 = vpop.eup %1407  ;;  %v528_v44 = vadd.f32 %v1922_v25, %v527_v43 }
  0xee   : > { %v499_v40 = vpop.f32.mrf.mxu0  ;;  %v554_v41 = vpack.c.bf16 %v1408_v39, %v1406_v37 }
  0xef   : > { %v500_v42 = vadd.f32 %v1922_v25, %v499_v40  ;;  %v1410_v45 = vpop.eup %1409 }
  0xf0   : > { %662 = vmatmul.bf16.vlgmr.msrb.gmra.mxu3 %v554_v41 }
  0xf1   : > { %1411 = vtanh.f32 %v500_v42 }
  0xf2   : > { %1413 = vtanh.f32 %v528_v44 }
  0xf4   : > { %v529_v49 = vpop.f32.mrf.mxu3 }
  0xf5   : > { %v530_v50 = vadd.f32 %v1922_v25, %v529_v49 }
  0xf6   : > { %v502_v46 = vpop.f32.mrf.mxu0 }
  0xf7   : > { %v1412_v47 = vpop.eup %1411  ;;  %1415 = vtanh.f32 %v530_v50  ;;  %v503_v51 = vadd.f32 %v1922_v25, %v502_v46 }
  0xf8   : > { %v549_v48 = vpack.c.bf16 %v1412_v47, %v1410_v45  ;;  %v1414_v53 = vpop.eup %1413 }
  0xf9   : > { %1417 = vtanh.f32 %v503_v51 }
  0xfa   : > { %637 = vmatmul.bf16.gmra.mxu1 %v549_v48 }
  0xfd   : > { %v1416_v55 = vpop.eup %1415 }
  0xfe   : > { %v504_v52 = vpop.f32.mrf.mxu0  ;;  %v555_v56 = vpack.c.bf16 %v1416_v55, %v1414_v53 }
  0xff   : > { %v505_v54 = vadd.f32 %v1922_v25, %v504_v52  ;;  %v1418_v57 = vpop.eup %1417 }
 0x100   : > { %667 = vmatmul.bf16.gmra.mxu3 %v555_v56 }
 0x101   : > { %1419 = vtanh.f32 %v505_v54 }
 0x106   : > { %v507_v58 = vpop.f32.mrf.mxu0 }
 0x107   : > { %v1420_v59 = vpop.eup %1419  ;;  %v508_v61 = vadd.f32 %v1922_v25, %v507_v58 }
 0x108   : > { %v550_v60 = vpack.c.bf16 %v1420_v59, %v1418_v57 }
 0x109   : > { %1421 = vtanh.f32 %v508_v61 }
 0x10a   : > { %642 = vmatmul.bf16.gmra.mxu1 %v550_v60 }
 0x10e   : > { %v509_v62 = vpop.f32.mrf.mxu0 }
 0x10f   : > { %v510_v63 = vadd.f32 %v1922_v25, %v509_v62  ;;  %v1422_v0 = vpop.eup %1421 }
 0x111   : > { %1423 = vtanh.f32 %v510_v63 }
 0x116   : > { %v512_v1 = vpop.f32.mrf.mxu0 }
 0x117   : > { %v1424_v2 = vpop.eup %1423  ;;  %v513_v5 = vadd.f32 %v1922_v25, %v512_v1 }
 0x118   : > { %v551_v3 = vpack.c.bf16 %v1424_v2, %v1422_v0 }
 0x119   : > { %1425 = vtanh.f32 %v513_v5 }
 0x11a   : > { %647 = vmatmul.bf16.gmra.mxu1 %v551_v3 }
 0x11e   : > { %v514_v7 = vpop.f32.mrf.mxu0 }
 0x11f   : > { %v515_v8 = vadd.f32 %v1922_v25, %v514_v7  ;;  %v1426_v10 = vpop.eup %1425 }
 0x121   : > { %1427 = vtanh.f32 %v515_v8 }
 0x126   : > { %v517_v11 = vpop.f32.mrf.mxu0 }
 0x127   : > { %v1428_v12 = vpop.eup %1427  ;;  %v518_v14 = vadd.f32 %v1922_v25, %v517_v11 }
 0x128   : > { %v552_v13 = vpack.c.bf16 %v1428_v12, %v1426_v10 }
 0x129   : > { %1429 = vtanh.f32 %v518_v14 }
 0x12a   : > { %652 = vmatmul.bf16.gmra.mxu1 %v552_v13 }
 0x12e   : > { %v519_v15 = vpop.f32.mrf.mxu0 }
 0x12f   : > { %v520_v16 = vadd.f32 %v1922_v25, %v519_v15  ;;  %v1430_v17 = vpop.eup %1429 }
 0x131   : > { %1431 = vtanh.f32 %v520_v16 }
 0x137   : > { %v1432_v18 = vpop.eup %1431 }
 0x138   : > { %v553_v19 = vpack.c.bf16 %v1432_v18, %v1430_v17  ;;  %v814_v18 = vlaneseq }
 0x13a   : > { %657 = vmatmul.bf16.gmra.mxu1 %v553_v19  ;;  %v1961_v19 = vand.u32 127, %v814_v18 }
 0x13c   : > { %vm816_vm0 = vcmp.lt.s32.totalorder %v1961_v19, 8 }
 0x167   : > { %v633_v25 = vpop.f32.mrf.mxu1 }
 0x168   : > { %v634_v27 = vadd.f32 %v1943_v26, %v633_v25 }
 0x16a   : > { %1433 = vtanh.f32 %v634_v27 }
 0x16f   : > { %v635_v28 = vpop.f32.mrf.mxu1 }
 0x170   : > { %v636_v29 = vadd.f32 %v1943_v26, %v635_v28  ;;  %v1434_v31 = vpop.eup %1433 }
 0x172   : > { %1435 = vtanh.f32 %v636_v29 }
 0x173   : > { %v663_v30 = vpop.f32.mrf.mxu3 }
 0x174   : > { %v664_v34 = vadd.f32 %v1943_v26, %v663_v30 }
 0x176   : > { %1437 = vtanh.f32 %v664_v34 }
 0x177   : > { %v638_v32 = vpop.f32.mrf.mxu1 }
 0x178   : > { %v1436_v33 = vpop.eup %1435  ;;  %v639_v38 = vadd.f32 %v1943_v26, %v638_v32 }
 0x179   : > { %v689_v35 = vpack.c.bf16 %v1436_v33, %v1434_v31 }
 0x17b   : > { %773 = vmatmul.bf16.vlgmr.msra.gmra.mxu2 %v689_v35  ;;  %v665_v36 = vpop.f32.mrf.mxu3 }
 0x17c   : > { %v666_v37 = vadd.f32 %v1943_v26, %v665_v36  ;;  %v1438_v41 = vpop.eup %1437 }
 0x17e   : > { %1439 = vtanh.f32 %v666_v37 }
 0x17f   : > { %v640_v39 = vpop.f32.mrf.mxu1  ;;  %1441 = vtanh.f32 %v639_v38 }
 0x180   : > { %v641_v40 = vadd.f32 %v1943_v26, %v640_v39 }
 0x182   : > { %1443 = vtanh.f32 %v641_v40 }
 0x183   : > { %v668_v46 = vpop.f32.mrf.mxu3 }
 0x184   : > { %v1440_v42 = vpop.eup %1439  ;;  %v669_v50 = vadd.f32 %v1943_v26, %v668_v46 }
 0x185   : > { %v695_v43 = vpack.c.bf16 %v1440_v42, %v1438_v41  ;;  %v1442_v44 = vpop.eup %1441 }
 0x187   : > { %v643_v45 = vpop.f32.mrf.mxu1  ;;  %803 = vmatmul.bf16.vlgmr.msra.gmra.mxu3 %v695_v43 }
 0x188   : > { %v1444_v47 = vpop.eup %1443  ;;  %v644_v49 = vadd.f32 %v1943_v26, %v643_v45 }
 0x189   : > { %v690_v48 = vpack.c.bf16 %v1444_v47, %v1442_v44 }
 0x18a   : > { %1445 = vtanh.f32 %v644_v49 }
 0x18b   : > { %778 = vmatmul.bf16.gmra.mxu2 %v690_v48  ;;  %v670_v52 = vpop.f32.mrf.mxu3  ;;  %1447 = vtanh.f32 %v669_v50 }
 0x18c   : > { %v671_v54 = vadd.f32 %v1943_v26, %v670_v52 }
 0x18f   : > { %v645_v51 = vpop.f32.mrf.mxu1 }
 0x190   : > { %v646_v53 = vadd.f32 %v1943_v26, %v645_v51  ;;  %v1446_v55 = vpop.eup %1445 }
 0x191   : > { %v1448_v56 = vpop.eup %1447 }
 0x192   : > { %1449 = vtanh.f32 %v646_v53 }
 0x193   : > { %1451 = vtanh.f32 %v671_v54 }
 0x197   : > { %v648_v57 = vpop.f32.mrf.mxu1 }
 0x198   : > { %v1450_v58 = vpop.eup %1449  ;;  %v649_v62 = vadd.f32 %v1943_v26, %v648_v57 }
 0x199   : > { %v1452_v59 = vpop.eup %1451  ;;  %v691_v60 = vpack.c.bf16 %v1450_v58, %v1446_v55 }
 0x19a   : > { %v696_v61 = vpack.c.bf16 %v1452_v59, %v1448_v56  ;;  %1453 = vtanh.f32 %v649_v62 }
 0x19b   : > { %783 = vmatmul.bf16.gmra.mxu2 %v691_v60 }
 0x19c   : > { %808 = vmatmul.bf16.gmra.mxu3 %v696_v61 }
 0x19f   : > { %v650_v63 = vpop.f32.mrf.mxu1 }
 0x1a0   : > { %v651_v0 = vadd.f32 %v1943_v26, %v650_v63  ;;  %v1454_v1 = vpop.eup %1453 }
 0x1a2   : > { %1455 = vtanh.f32 %v651_v0 }
 0x1a7   : > { %v653_v2 = vpop.f32.mrf.mxu1 }
 0x1a8   : > { %v1456_v3 = vpop.eup %1455  ;;  %v654_v5 = vadd.f32 %v1943_v26, %v653_v2 }
 0x1a9   : > { %v692_v4 = vpack.c.bf16 %v1456_v3, %v1454_v1 }
 0x1aa   : > { %1457 = vtanh.f32 %v654_v5 }
 0x1ab   : > { %788 = vmatmul.bf16.gmra.mxu2 %v692_v4 }
 0x1af   : > { %v655_v6 = vpop.f32.mrf.mxu1 }
 0x1b0   : > { %v656_v7 = vadd.f32 %v1943_v26, %v655_v6  ;;  %v1458_v8 = vpop.eup %1457 }
 0x1b2   : > { %1459 = vtanh.f32 %v656_v7 }
 0x1b7   : > { %v658_v9 = vpop.f32.mrf.mxu1 }
 0x1b8   : > { %v1460_v10 = vpop.eup %1459  ;;  %v659_v12 = vadd.f32 %v1943_v26, %v658_v9 }
 0x1b9   : > { %v693_v11 = vpack.c.bf16 %v1460_v10, %v1458_v8 }
 0x1ba   : > { %1461 = vtanh.f32 %v659_v12 }
 0x1bb   : > { %793 = vmatmul.bf16.gmra.mxu2 %v693_v11 }
 0x1bf   : > { %v660_v13 = vpop.f32.mrf.mxu1 }
 0x1c0   : > { %v661_v14 = vadd.f32 %v1943_v26, %v660_v13  ;;  %v1462_v15 = vpop.eup %1461 }
 0x1c2   : > { %1463 = vtanh.f32 %v661_v14 }
 0x1c8   : > { %v1464_v16 = vpop.eup %1463 }
 0x1c9   : > { %v694_v17 = vpack.c.bf16 %v1464_v16, %v1462_v15 }
 0x1cb   : > { %798 = vmatmul.bf16.gmra.mxu2 %v694_v17 }
 0x1fe   : > { %v774_v21 = vpop.f32.mrf.mxu2 }
 0x1ff   : > { %v775_v22 = vadd.f32 %v1966_v20, %v774_v21 }
 0x201   : > { %v1972_v23 = vsel %vm816_vm0, %v775_v22, -inf }
 0x202   : > { %833 = vmax.xlane.f32.xlu0 %v1972_v23 }
 0x206   : > { %v776_v24 = vpop.f32.mrf.mxu2 }
 0x207   : > { %v777_v25 = vadd.f32 %v1966_v20, %v776_v24 }
 0x209   : > { %v1978_v26 = vsel %vm816_vm0, %v777_v25, -inf }
 0x20a   : > { %835 = vmax.xlane.f32.xlu0 %v1978_v26  ;;  %v804_v27 = vpop.f32.mrf.mxu3 }
 0x20b   : > { %v805_v28 = vadd.f32 %v1966_v20, %v804_v27 }
 0x20d   : > { %v1985_v31 = vsel %vm816_vm0, %v805_v28, -inf }
 0x20e   : > { %v779_v29 = vpop.f32.mrf.mxu2 }
 0x20f   : > { %v780_v30 = vadd.f32 %v1966_v20, %v779_v29 }
 0x211   : > { %v1989_v32 = vsel %vm816_vm0, %v780_v30, -inf }
 0x212   : > { %837 = vmax.xlane.f32.xlu1 %v1989_v32  ;;  %857 = vmax.xlane.f32.xlu0 %v1985_v31  ;;  %v806_v47 = vpop.f32.mrf.mxu3 }
 0x213   : > { %v807_v62 = vadd.f32 %v1966_v20, %v806_v47 }
 0x215   : > { %v2055_v2 = vsel %vm816_vm0, %v807_v62, -inf }
 0x216   : > { %v781_v33 = vpop.f32.mrf.mxu2 }
 0x217   : > { %v782_v34 = vadd.f32 %v1966_v20, %v781_v33 }
 0x219   : > { %v1996_v35 = vsel %vm816_vm0, %v782_v34, -inf }
 0x21a   : > { %839 = vmax.xlane.f32.xlu1 %v1996_v35 }
 0x21e   : > { %v784_v36 = vpop.f32.mrf.mxu2 }
 0x21f   : > { %v785_v37 = vadd.f32 %v1966_v20, %v784_v36  ;;  %v809_v51 = vpop.f32.mrf.mxu3 }
 0x220   : > { %v810_v3 = vadd.f32 %v1966_v20, %v809_v51 }
 0x221   : > { %v2002_v38 = vsel %vm816_vm0, %v785_v37, -inf }
 0x222   : > { %841 = vmax.xlane.f32.xlu2 %v2002_v38  ;;  %v2062_v4 = vsel %vm816_vm0, %v810_v3, -inf }
 0x226   : > { %v786_v39 = vpop.f32.mrf.mxu2 }
 0x227   : > { %v787_v40 = vadd.f32 %v1966_v20, %v786_v39  ;;  %v811_v56 = vpop.f32.mrf.mxu3 }
 0x228   : > { %v812_v57 = vadd.f32 %v1966_v20, %v811_v56 }
 0x229   : > { %v2008_v41 = vsel %vm816_vm0, %v787_v40, -inf }
 0x22a   : > { %843 = vmax.xlane.f32.xlu2 %v2008_v41  ;;  %v2043_v61 = vsel %vm816_vm0, %v812_v57, -inf }
 0x22e   : > { %v789_v42 = vpop.f32.mrf.mxu2 }
 0x22f   : > { %v790_v43 = vadd.f32 %v1966_v20, %v789_v42 }
 0x231   : > { %v2014_v44 = vsel %vm816_vm0, %v790_v43, -inf }
 0x232   : > { %845 = vmax.xlane.f32.xlu0 %v2014_v44 }
 0x236   : > { %v791_v45 = vpop.f32.mrf.mxu2 }
 0x237   : > { %v792_v46 = vadd.f32 %v1966_v20, %v791_v45 }
 0x239   : > { %v2020_v48 = vsel %vm816_vm0, %v792_v46, -inf }
 0x23a   : > { %847 = vmax.xlane.f32.xlu1 %v2020_v48 }
 0x23e   : > { %v794_v49 = vpop.f32.mrf.mxu2 }
 0x23f   : > { %v795_v50 = vadd.f32 %v1966_v20, %v794_v49 }
 0x241   : > { %v2026_v52 = vsel %vm816_vm0, %v795_v50, -inf }
 0x242   : > { %849 = vmax.xlane.f32.xlu2 %v2026_v52 }
 0x246   : > { %v796_v53 = vpop.f32.mrf.mxu2 }
 0x247   : > { %v797_v54 = vadd.f32 %v1966_v20, %v796_v53 }
 0x249   : > { %v2032_v55 = vsel %vm816_vm0, %v797_v54, -inf }
 0x24a   : > { %851 = vmax.xlane.f32.xlu0 %v2032_v55 }
 0x24e   : > { %v799_v58 = vpop.f32.mrf.mxu2 }
 0x24f   : > { %v800_v59 = vadd.f32 %v1966_v20, %v799_v58 }
 0x251   : > { %v2039_v60 = vsel %vm816_vm0, %v800_v59, -inf }
 0x252   : > { %853 = vmax.xlane.f32.xlu1 %v2039_v60  ;;  %863 = vmax.xlane.f32.xlu0 %v2043_v61 }
 0x256   : > { %v801_v63 = vpop.f32.mrf.mxu2 }
 0x257   : > { %v802_v0 = vadd.f32 %v1966_v20, %v801_v63 }
 0x259   : > { %v2051_v1 = vsel %vm816_vm0, %v802_v0, -inf }
 0x25a   : > { %855 = vmax.xlane.f32.xlu2 %v2051_v1  ;;  %859 = vmax.xlane.f32.xlu1 %v2055_v2 }
 0x262   : > { %861 = vmax.xlane.f32.xlu2 %v2062_v4 }
 0x275   : > { %v834_v5 = vpop.xlane.xlu0 %833 }
 0x276   : > { %v865_v6 = vsub.f32 %v1972_v23, %v834_v5 }
 0x278   : > { %v881_v7 = vmul.f32 1.442695, %v865_v6 }
 0x27a   : > { %1465 = vpow2.f32 %v881_v7 }
 0x27d   : > { %v836_v8 = vpop.xlane.xlu0 %835 }
 0x27e   : > { %v866_v9 = vsub.f32 %v1978_v26, %v836_v8 }
 0x280   : > { %v2067_v10 = vpop.eup %1465  ;;  %v883_v11 = vmul.f32 1.442695, %v866_v9 }
 0x281   : > { %913 = vadd.xlane.f32.xlu1 %v2067_v10 }
 0x282   : > { %1467 = vpow2.f32 %v883_v11 }
 0x285   : > { %v838_v12 = vpop.xlane.xlu1 %837  ;;  %v858_v13 = vpop.xlane.xlu0 %857 }
 0x286   : > { %v867_v14 = vsub.f32 %v1989_v32, %v838_v12  ;;  %v877_v15 = vsub.f32 %v1985_v31, %v858_v13 }
 0x288   : > { %v2072_v16 = vpop.eup %1467  ;;  %v885_v17 = vmul.f32 1.442695, %v867_v14  ;;  %v905_v18 = vmul.f32 1.442695, %v877_v15 }
 0x289   : > { %915 = vadd.xlane.f32.xlu2 %v2072_v16 }
 0x28a   : > { %1469 = vpow2.f32 %v885_v17 }
 0x28b   : > { %1471 = vpow2.f32 %v905_v18 }
 0x28d   : > { %v840_v19 = vpop.xlane.xlu1 %839 }
 0x28e   : > { %v868_v20 = vsub.f32 %v1996_v35, %v840_v19 }
 0x290   : > { %v2076_v21 = vpop.eup %1469  ;;  %v887_v22 = vmul.f32 1.442695, %v868_v20 }
 0x291   : > { %v2078_v23 = vpop.eup %1471  ;;  %917 = vadd.xlane.f32.xlu0 %v2076_v21 }
 0x292   : > { %1473 = vpow2.f32 %v887_v22  ;;  %937 = vadd.xlane.f32.xlu1 %v2078_v23 }
 0x295   : > { %v842_v24 = vpop.xlane.xlu2 %841 }
 0x296   : > { %v869_v25 = vsub.f32 %v2002_v38, %v842_v24 }
 0x298   : > { %v2083_v26 = vpop.eup %1473  ;;  %v889_v27 = vmul.f32 1.442695, %v869_v25 }
 0x29a   : > { %1475 = vpow2.f32 %v889_v27  ;;  %919 = vadd.xlane.f32.xlu1 %v2083_v26 }
 0x29d   : > { %v844_v28 = vpop.xlane.xlu2 %843 }
 0x29e   : > { %v870_v29 = vsub.f32 %v2008_v41, %v844_v28 }
 0x2a0   : > { %v2087_v30 = vpop.eup %1475  ;;  %v891_v31 = vmul.f32 1.442695, %v870_v29 }
 0x2a1   : > { %921 = vadd.xlane.f32.xlu2 %v2087_v30 }
 0x2a2   : > { %1477 = vpow2.f32 %v891_v31 }
 0x2a5   : > { %v846_v32 = vpop.xlane.xlu0 %845 }
 0x2a6   : > { %v871_v33 = vsub.f32 %v2014_v44, %v846_v32 }
 0x2a8   : > { %v2091_v34 = vpop.eup %1477  ;;  %v893_v35 = vmul.f32 1.442695, %v871_v33 }
 0x2a9   : > { %923 = vadd.xlane.f32.xlu0 %v2091_v34 }
 0x2aa   : > { %1479 = vpow2.f32 %v893_v35 }
 0x2ad   : > { %v848_v36 = vpop.xlane.xlu1 %847 }
 0x2ae   : > { %v872_v37 = vsub.f32 %v2020_v48, %v848_v36 }
 0x2b0   : > { %v2095_v38 = vpop.eup %1479  ;;  %v895_v39 = vmul.f32 1.442695, %v872_v37 }
 0x2b1   : > { %925 = vadd.xlane.f32.xlu1 %v2095_v38 }
 0x2b2   : > { %1481 = vpow2.f32 %v895_v39 }
 0x2b5   : > { %v850_v40 = vpop.xlane.xlu2 %849 }
 0x2b6   : > { %v873_v41 = vsub.f32 %v2026_v52, %v850_v40 }
 0x2b8   : > { %v2099_v42 = vpop.eup %1481  ;;  %v897_v43 = vmul.f32 1.442695, %v873_v41 }
 0x2b9   : > { %927 = vadd.xlane.f32.xlu2 %v2099_v42 }
 0x2ba   : > { %1483 = vpow2.f32 %v897_v43 }
 0x2bd   : > { %v852_v44 = vpop.xlane.xlu0 %851 }
 0x2be   : > { %v874_v45 = vsub.f32 %v2032_v55, %v852_v44 }
 0x2c0   : > { %v2103_v46 = vpop.eup %1483  ;;  %v899_v47 = vmul.f32 1.442695, %v874_v45 }
 0x2c1   : > { %929 = vadd.xlane.f32.xlu0 %v2103_v46 }
 0x2c2   : > { %1485 = vpow2.f32 %v899_v47 }
 0x2c5   : > { %v854_v48 = vpop.xlane.xlu1 %853  ;;  %v864_v49 = vpop.xlane.xlu0 %863 }
 0x2c6   : > { %v875_v50 = vsub.f32 %v2039_v60, %v854_v48  ;;  %v880_v51 = vsub.f32 %v2043_v61, %v864_v49 }
 0x2c8   : > { %v2108_v52 = vpop.eup %1485  ;;  %v901_v53 = vmul.f32 1.442695, %v875_v50  ;;  %v911_v54 = vmul.f32 1.442695, %v880_v51 }
 0x2c9   : > { %931 = vadd.xlane.f32.xlu1 %v2108_v52 }
 0x2ca   : > { %1487 = vpow2.f32 %v901_v53 }
 0x2cb   : > { %1489 = vpow2.f32 %v911_v54 }
 0x2cd   : > { %v856_v55 = vpop.xlane.xlu2 %855  ;;  %v860_v56 = vpop.xlane.xlu1 %859 }
 0x2ce   : > { %v876_v57 = vsub.f32 %v2051_v1, %v856_v55  ;;  %v878_v58 = vsub.f32 %v2055_v2, %v860_v56 }
 0x2d0   : > { %v2113_v59 = vpop.eup %1487  ;;  %v903_v62 = vmul.f32 1.442695, %v876_v57  ;;  %v907_v60 = vmul.f32 1.442695, %v878_v58 }
 0x2d1   : > { %v2115_v63 = vpop.eup %1489  ;;  %933 = vadd.xlane.f32.xlu2 %v2113_v59 }
 0x2d2   : > { %1491 = vpow2.f32 %v903_v62  ;;  %943 = vadd.xlane.f32.xlu1 %v2115_v63 }
 0x2d3   : > { %1493 = vpow2.f32 %v907_v60 }
 0x2d5   : > { %v862_v61 = vpop.xlane.xlu2 %861 }
 0x2d6   : > { %v879_v0 = vsub.f32 %v2062_v4, %v862_v61 }
 0x2d8   : > { %v2120_v3 = vpop.eup %1491  ;;  %v909_v1 = vmul.f32 1.442695, %v879_v0 }
 0x2d9   : > { %v2122_v2 = vpop.eup %1493  ;;  %935 = vadd.xlane.f32.xlu0 %v2120_v3 }
 0x2da   : > { %1495 = vpow2.f32 %v909_v1  ;;  %939 = vadd.xlane.f32.xlu2 %v2122_v2 }
 0x2e0   : > { %v2126_v5 = vpop.eup %1495 }
 0x2e1   : > { %941 = vadd.xlane.f32.xlu0 %v2126_v5 }
 0x2f4   : > { %v914_v6 = vpop.xlane.xlu1 %913 }
 0x2f5   : > { %1497 = vrcp.f32 %v914_v6 }
 0x2fb   : > { %v1498_v7 = vpop.eup %1497 }
 0x2fc   : > { %v961_v4 = vmul.f32 %v1498_v7, %v2067_v10  ;;  %v916_v8 = vpop.xlane.xlu2 %915 }
 0x2fd   : > { %1499 = vrcp.f32 %v916_v8 }
 0x2fe   : > { %977 = vst [vmem:[%s2131_s29] sm:$0xff] %v961_v4 }
 0x303   : > { %v1500_v9 = vpop.eup %1499 }
 0x304   : > { %v962_v11 = vmul.f32 %v1500_v9, %v2072_v16  ;;  %v918_v12 = vpop.xlane.xlu0 %917 }
 0x305   : > { %v938_v13 = vpop.xlane.xlu1 %937  ;;  %1501 = vrcp.f32 %v918_v12 }
 0x306   : > { %978 = vst [vmem:[%s2131_s29 + $0x8] sm:$0xff] %v962_v11  ;;  %1503 = vrcp.f32 %v938_v13 }
 0x30b   : > { %v1502_v14 = vpop.eup %1501 }
 0x30c   : > { %v1504_v10 = vpop.eup %1503  ;;  %v963_v15 = vmul.f32 %v1502_v14, %v2076_v21 }
 0x30d   : > { %v973_v17 = vmul.f32 %v1504_v10, %v2078_v23  ;;  %v920_v18 = vpop.xlane.xlu1 %919 }
 0x30e   : > { %979 = vst [vmem:[%s2131_s29 + $0x10] sm:$0xff] %v963_v15  ;;  %1505 = vrcp.f32 %v920_v18 }
 0x30f   : > { %989 = vst [vmem:[%s2131_s29 + $0x60] sm:$0xff] %v973_v17 }
 0x314   : > { %v1506_v19 = vpop.eup %1505  ;;  %v922_v16 = vpop.xlane.xlu2 %921 }
 0x315   : > { %v964_v20 = vmul.f32 %v1506_v19, %v2083_v26  ;;  %1507 = vrcp.f32 %v922_v16 }
 0x317   : > { %980 = vst [vmem:[%s2131_s29 + $0x18] sm:$0xff] %v964_v20 }
 0x31b   : > { %v1508_v22 = vpop.eup %1507 }
 0x31c   : > { %v965_v24 = vmul.f32 %v1508_v22, %v2087_v30  ;;  %v924_v25 = vpop.xlane.xlu0 %923 }
 0x31d   : > { %1509 = vrcp.f32 %v924_v25 }
 0x31e   : > { %981 = vst [vmem:[%s2131_s29 + $0x20] sm:$0xff] %v965_v24 }
 0x323   : > { %v1510_v21 = vpop.eup %1509 }
 0x324   : > { %v966_v23 = vmul.f32 %v1510_v21, %v2091_v34  ;;  %v926_v27 = vpop.xlane.xlu1 %925 }
 0x325   : > { %1511 = vrcp.f32 %v926_v27 }
 0x326   : > { %982 = vst [vmem:[%s2131_s29 + $0x28] sm:$0xff] %v966_v23 }
 0x32b   : > { %v1512_v28 = vpop.eup %1511 }
 0x32c   : > { %v967_v26 = vmul.f32 %v1512_v28, %v2095_v38  ;;  %v928_v29 = vpop.xlane.xlu2 %927 }
 0x32d   : > { %1513 = vrcp.f32 %v928_v29 }
 0x32e   : > { %983 = vst [vmem:[%s2131_s29 + $0x30] sm:$0xff] %v967_v26 }
 0x333   : > { %v1514_v31 = vpop.eup %1513 }
 0x334   : > { %v968_v30 = vmul.f32 %v1514_v31, %v2099_v42  ;;  %v930_v32 = vpop.xlane.xlu0 %929 }
 0x335   : > { %1515 = vrcp.f32 %v930_v32 }
 0x336   : > { %984 = vst [vmem:[%s2131_s29 + $0x38] sm:$0xff] %v968_v30 }
 0x33b   : > { %v1516_v33 = vpop.eup %1515 }
 0x33c   : > { %v969_v34 = vmul.f32 %v1516_v33, %v2103_v46  ;;  %v932_v35 = vpop.xlane.xlu1 %931 }
 0x33d   : > { %1517 = vrcp.f32 %v932_v35 }
 0x33e   : > { %985 = vst [vmem:[%s2131_s29 + $0x40] sm:$0xff] %v969_v34 }
 0x343   : > { %v1518_v36 = vpop.eup %1517 }
 0x344   : > { %v970_v37 = vmul.f32 %v1518_v36, %v2108_v52  ;;  %v934_v38 = vpop.xlane.xlu2 %933 }
 0x345   : > { %1519 = vrcp.f32 %v934_v38  ;;  %v944_v39 = vpop.xlane.xlu1 %943 }
 0x346   : > { %986 = vst [vmem:[%s2131_s29 + $0x48] sm:$0xff] %v970_v37  ;;  %1521 = vrcp.f32 %v944_v39 }
 0x34b   : > { %v1520_v40 = vpop.eup %1519 }
 0x34c   : > { %v1522_v41 = vpop.eup %1521  ;;  %v971_v42 = vmul.f32 %v1520_v40, %v2113_v59  ;;  %v936_v43 = vpop.xlane.xlu0 %935 }
 0x34d   : > { %v976_v44 = vmul.f32 %v1522_v41, %v2115_v63  ;;  %v940_v45 = vpop.xlane.xlu2 %939  ;;  %1523 = vrcp.f32 %v936_v43 }
 0x34e   : > { %987 = vst [vmem:[%s2131_s29 + $0x50] sm:$0xff] %v971_v42  ;;  %1525 = vrcp.f32 %v940_v45 }
 0x34f   : > { %992 = vst [vmem:[%s2131_s29 + $0x78] sm:$0xff] %v976_v44 }
 0x353   : > { %v1524_v46 = vpop.eup %1523 }
 0x354   : > { %v1526_v47 = vpop.eup %1525  ;;  %v972_v48 = vmul.f32 %v1524_v46, %v2120_v3  ;;  %v942_v49 = vpop.xlane.xlu0 %941 }
 0x355   : > { %v974_v50 = vmul.f32 %v1526_v47, %v2122_v2  ;;  %1527 = vrcp.f32 %v942_v49 }
 0x356   : > { %988 = vst [vmem:[%s2131_s29 + $0x58] sm:$0xff] %v972_v48 }
 0x357   : > { %990 = vst [vmem:[%s2131_s29 + $0x68] sm:$0xff] %v974_v50 }
 0x35b   : > { %v1528_v51 = vpop.eup %1527 }
 0x35c   : > { %v975_v52 = vmul.f32 %v1528_v51, %v2126_v5 }
 0x35e   : > { %991 = vst [vmem:[%s2131_s29 + $0x70] sm:$0xff] %v975_v52 }
 0x35f   : > { %1676 = shalt.err (!%p1673_p10)
}
 0x360   : > { %s1730_s15 = smov 128   ;;  %s1731_s29 = smov 8  }
 0x361   : > { %1331 = dma.vmem_to_hbm [thread:$0]  (%p1863_p3), %s1007_s1, 2048, %s1009_s23, %s994_s28, %s1730_s15, %s1730_s15, %s1731_s29  }
 0x362 PF: > { %s1023_s9 = sand.u32 1, %s1711_s24   ;;  %p2218_p12 = scmp.ge.s32.totalorder %s1723_s27, 2 }
 0x363   : > { %s1024_s21 = scalar_lea.sflag [#allocation4], %s1023_s9 }
 0x364   : > { %p1348_p13 = pnand %p2218_p12, %p1807_p6 }
 0x366   : > { %p1349_p0 = pneg %p1348_p13 }
 0x368   : > { %1706 = dma.done.wait (%p1349_p0), %s1024_s21, 2048  }
 0x369   : > { %1708 = vsyncadd (%p1349_p0), %s1024_s21, 4294965248  ;;  %p22_p5 = scmp.ge.s32.totalorder %s1845_s13, 4   ;;  %s2219_s24 = smov %s1715_s25 }
 0x36a   : > { %s2220_s25 = smov %s1719_s26  ;;  %s2221_s26 = smov %s1859_s17 }
 0x36b   : > { %s2222_s27 = smov %s1845_s13  ;;  %24 = sbr.rel (!%p22_p5) target bundleno = 9 (0x9), region = 105 }
 0x370   :  { %1030 = vsyncpa [#allocation3], 1 }
 0x371   :  { %1032 = vsyncpa [#allocation3 + $0x1], 1 }
 0x372   :  { %1033 = vsyncpa [#allocation6], 1 }
 0x373   :  { %1034 = vsyncpa [#allocation9], 1 }
 0x374   :  { %1035 = vsyncpa [#allocation4], 1 }
 0x375   :  { %1037 = vsyncpa [#allocation4 + $0x1], 1 }

</bundles_post_ra>
